<compile_context>
chip_gen: v7x
topology: tpu7x:2x2x1
jax: 0.10.0
libtpu: 0.0.40
codegen_flags: <defaults>
</compile_context>

<pallas_src>
import functools

import jax
import jax.numpy as jnp
from jax import lax
from jax.experimental import pallas as pl
from jax.experimental.pallas import tpu as pltpu

_MAX_BATCH_TILE = 8  # bound on the in-kernel unroll; grid absorbs larger batches


def lsa_kernel(x_ref, wqkv_ref, wout_ref, temp_ref, o_ref, head_ref, *,
               heads, dim_head, batch_tile, seq_len):
    """Fused LSA forward for `batch_tile` batch elements.

    x_ref    : (batch_tile * n, dim)     VMEM  (batch flattened into rows)
    wqkv_ref : (dim, 3*inner_dim)        VMEM
    wout_ref : (inner_dim, dim)          VMEM
    temp_ref : (1, 1)                    SMEM  (learned log-temperature scalar)
    o_ref    : (batch_tile * n, dim)     VMEM
    head_ref : (batch_tile * n, inner)   VMEM scratch (per-head context slab)
    """
    n = seq_len
    inner = heads * dim_head

    # One fused QKV projection for the whole block (single big MXU matmul).
    qkv = jnp.dot(x_ref[...], wqkv_ref[...],
                  preferred_element_type=jnp.float32)          # (Bt*n, 3*inner)

    # Hoisted scale: pre-multiply all Q columns once per grid step.
    scale = jnp.exp(temp_ref[0, 0])                            # exp(log(dim_head**-0.5))
    q_all = qkv[:, :inner] * scale                             # (Bt*n, inner)

    # Diagonal (self-token) mask, built once per grid step.  jnp.where keeps
    # it reference-exact (no risk of additive-bias overflow to -inf).
    row = lax.broadcasted_iota(jnp.int32, (n, n), 0)
    col = lax.broadcasted_iota(jnp.int32, (n, n), 1)
    diag = row == col
    mask_value = -jnp.finfo(jnp.float32).max

    for bi in range(batch_tile):                               # static, <= _MAX_BATCH_TILE
        r0 = bi * n
        r1 = r0 + n
        for h in range(heads):                                 # static
            c = h * dim_head
            qh = q_all[r0:r1, c:c + dim_head]                  # (n, d), pre-scaled
            kh = qkv[r0:r1, inner + c:inner + c + dim_head]    # (n, d)
            vh = qkv[r0:r1, 2 * inner + c:2 * inner + c + dim_head]

            # q @ k^T without materializing a transpose.
            dots = lax.dot_general(qh, kh, (((1,), (1,)), ((), ())),
                                   preferred_element_type=jnp.float32)   # (n, n)
            dots = jnp.where(diag, mask_value, dots)

            # Numerically-stable softmax (f32 throughout, exact reciprocal).
            m = jnp.max(dots, axis=-1, keepdims=True)
            e = jnp.exp(dots - m)
            attn = e * pl.reciprocal(jnp.sum(e, axis=-1, keepdims=True),
                                     approx=False)

            # Stage this head's context into the shared slab (plain store at
            # lane offset h*dim_head; no XLU concat, no per-head out-proj).
            head_ref[r0:r1, c:c + dim_head] = jnp.dot(
                attn, vh, preferred_element_type=jnp.float32)  # (n, d)

    # ONE output projection for the whole block: (Bt*n, inner) @ (inner, dim).
    o_ref[...] = jnp.dot(head_ref[...], wout_ref[...],
                         preferred_element_type=jnp.float32).astype(o_ref.dtype)


def _pick_batch_tile(b):
    # Small batches: single grid step (extra steps are pure ~0.35us overhead
    # on the single-TC v5e/v6e; on v7x sub-microsecond per-step work gains
    # nothing from the second core).  Larger batches: largest divisor of b
    # that is <= _MAX_BATCH_TILE, so the in-kernel unroll stays bounded and
    # the grid absorbs (and megacore-shards) the rest.
    if b <= _MAX_BATCH_TILE:
        return b
    for t in range(_MAX_BATCH_TILE, 0, -1):
        if b % t == 0:
            return t
    return 1


def lsa_forward(x, w_qkv, w_out, temperature, *, heads, dim_head, batch_tile=None):
    """x: (b, n, dim) f32.  w_qkv: (dim, 3*inner).  w_out: (inner, dim)."""
    b, n, dim = x.shape
    inner = heads * dim_head
    assert w_qkv.shape == (dim, 3 * inner)
    assert w_out.shape == (inner, dim)

    if batch_tile is None:
        batch_tile = _pick_batch_tile(b)
    assert b % batch_tile == 0
    grid_len = b // batch_tile

    # Flatten batch into rows so the kernel sees a single lane-layout-friendly
    # 2-D slab (no in-kernel reshapes); row blocks are multiples of n.
    x2d = x.reshape(b * n, dim)
    temp = jnp.reshape(temperature, (1, 1)).astype(jnp.float32)

    kernel = functools.partial(lsa_kernel, heads=heads, dim_head=dim_head,
                               batch_tile=batch_tile, seq_len=n)
    out2d = pl.pallas_call(
        kernel,
        out_shape=jax.ShapeDtypeStruct((b * n, dim), jnp.float32),
        grid_spec=pltpu.PrefetchScalarGridSpec(
            num_scalar_prefetch=0,
            grid=(grid_len,),
            in_specs=[
                pl.BlockSpec((batch_tile * n, dim), lambda i: (i, 0)),
                # Constant block indices -> blocks stay resident across grid
                # steps (no re-DMA).  At ViT-scale weights, single-buffer them
                # (pl.Buffered(1)) and set vmem_limit_bytes for v7x's 64 MiB.
                pl.BlockSpec((dim, 3 * inner), lambda i: (0, 0)),
                pl.BlockSpec((inner, dim), lambda i: (0, 0)),
                pl.BlockSpec(memory_space=pltpu.MemorySpace.SMEM),
            ],
            out_specs=pl.BlockSpec((batch_tile * n, dim), lambda i: (i, 0)),
            scratch_shapes=[
                pltpu.VMEM((batch_tile * n, inner), jnp.float32),
            ],
        ),
        compiler_params=pltpu.CompilerParams(dimension_semantics=("parallel",)),
    )(x2d, w_qkv, w_out, temp)
    return out2d.reshape(b, n, dim)


def lsa_reference(x, w_qkv, w_out, temperature, *, heads, dim_head):
    """Pure-JAX reference matching the PyTorch module (eval mode)."""
    b, n, dim = x.shape
    inner = heads * dim_head
    qkv = jnp.einsum("bnd,de->bne", x, w_qkv)
    q, k, v = jnp.split(qkv, 3, axis=-1)

    def to_heads(t):
        return jnp.transpose(t.reshape(b, n, heads, dim_head), (0, 2, 1, 3))

    q, k, v = map(to_heads, (q, k, v))
    dots = jnp.einsum("bhnd,bhmd->bhnm", q, k) * jnp.exp(temperature)
    mask = jnp.eye(n, dtype=bool)
    dots = jnp.where(mask[None, None], -jnp.finfo(jnp.float32).max, dots)
    attn = jax.nn.softmax(dots, axis=-1)
    out = jnp.einsum("bhnm,bhmd->bhnd", attn, v)
    out = jnp.transpose(out, (0, 2, 1, 3)).reshape(b, n, inner)
    return jnp.einsum("bne,ed->bnd", out, w_out)


if __name__ == "__main__":
    # Small shapes consistent with the module: batch=2, seq=8, dim=32,
    # heads=4, dim_head=16 -> inner_dim=64.
    b, n, dim = 2, 8, 32
    heads, dim_head = 4, 16
    inner = heads * dim_head

    key = jax.random.PRNGKey(0)
    kx, kq, ko = jax.random.split(key, 3)

    x = jax.random.normal(kx, (b, n, dim), dtype=jnp.float32)

    # Deterministic nn.Linear-style init (uniform(-1/sqrt(fan_in), 1/sqrt(fan_in))),
    # stored pre-transposed for the kernel.
    bound_qkv = 1.0 / (dim ** 0.5)
    w_qkv = jax.random.uniform(kq, (dim, 3 * inner), jnp.float32, -bound_qkv, bound_qkv)
    bound_out = 1.0 / (inner ** 0.5)
    w_out = jax.random.uniform(ko, (inner, dim), jnp.float32, -bound_out, bound_out)

    # temperature = log(dim_head ** -0.5), same as the PyTorch parameter init.
    temperature = jnp.log(jnp.float32(dim_head) ** -0.5)

    out = lsa_forward(x, w_qkv, w_out, temperature, heads=heads, dim_head=dim_head)
    out = jax.block_until_ready(out)

    ref = lsa_reference(x, w_qkv, w_out, temperature, heads=heads, dim_head=dim_head)
    assert out.shape == (b, n, dim)
    # Exact reciprocal + f32 math end-to-end -> tight tolerance.
    assert jnp.allclose(out, ref, atol=1e-5, rtol=1e-5), "Pallas output mismatch vs reference"

    print("KERNEL_OK")
</pallas_src>

<mosaic_0001>
module attributes {stable_mosaic.version = 11 : i64} {
  func.func @lsa_kernel(%arg0: i32, %arg1: memref<16x32xf32, #tpu.memory_space<vmem>>, %arg2: memref<32x192xf32, #tpu.memory_space<vmem>>, %arg3: memref<64x32xf32, #tpu.memory_space<vmem>>, %arg4: memref<1x1xf32, #tpu.memory_space<smem>>, %arg5: memref<16x32xf32, #tpu.memory_space<vmem>>, %arg6: memref<16x64xf32, #tpu.memory_space<vmem>>) attributes {dimension_semantics = [#tpu.dimension_semantics<parallel>], iteration_bounds = array<i64: 1>, scalar_prefetch = 0 : i64, scratch_operands = 1 : i64, tpu.core_type = #tpu.core_type<tc>, window_params = [{transform_indices = @transform_0, window_bounds = array<i64: 16, 32>}, {pipeline_mode = #tpu.pipeline_mode<synchronous>, transform_indices = @transform_1, window_bounds = array<i64: 32, 192>}, {pipeline_mode = #tpu.pipeline_mode<synchronous>, transform_indices = @transform_2, window_bounds = array<i64: 64, 32>}, {transform_indices = @transform_3, window_bounds = array<i64: 1, 1>}, {transform_indices = @transform_4, window_bounds = array<i64: 16, 32>}]} {
    %c0 = arith.constant 0 : index
    %c0_0 = arith.constant 0 : index
    %0 = vector.load %arg1[%c0, %c0_0] : memref<16x32xf32, #tpu.memory_space<vmem>>, vector<16x32xf32>
    %c0_1 = arith.constant 0 : index
    %c0_2 = arith.constant 0 : index
    %1 = vector.load %arg2[%c0_1, %c0_2] : memref<32x192xf32, #tpu.memory_space<vmem>>, vector<32x192xf32>
    %cst = arith.constant dense<0.000000e+00> : vector<16x192xf32>
    %2 = tpu.matmul %0, %1, %cst {dimension_numbers = #tpu.dot_dimension_numbers<[1], [0], [0], [1], [0, 0, 1, 1], [], []>} : vector<16x32xf32>, vector<32x192xf32>, vector<16x192xf32> -> vector<16x192xf32>
    %c0_3 = arith.constant 0 : index
    %c0_4 = arith.constant 0 : index
    %3 = memref.load %arg4[%c0_3, %c0_4] : memref<1x1xf32, #tpu.memory_space<smem>>
    %4 = math.exp %3 : f32
    %5 = vector.extract_strided_slice %2 {offsets = [0, 0], sizes = [16, 64], strides = [1, 1]} : vector<16x192xf32> to vector<16x64xf32>
    %6 = vector.broadcast %4 : f32 to vector<16x64xf32>
    %7 = arith.mulf %5, %6 : vector<16x64xf32>
    %8 = tpu.iota {dimensions = array<i32: 0>} : vector<8x8xi32>
    %9 = tpu.iota {dimensions = array<i32: 1>} : vector<8x8xi32>
    %10 = arith.cmpi eq, %8, %9 : vector<8x8xi32>
    %11 = vector.extract_strided_slice %7 {offsets = [0, 0], sizes = [8, 16], strides = [1, 1]} : vector<16x64xf32> to vector<8x16xf32>
    %12 = vector.extract_strided_slice %2 {offsets = [0, 64], sizes = [8, 16], strides = [1, 1]} : vector<16x192xf32> to vector<8x16xf32>
    %13 = vector.extract_strided_slice %2 {offsets = [0, 128], sizes = [8, 16], strides = [1, 1]} : vector<16x192xf32> to vector<8x16xf32>
    %cst_5 = arith.constant dense<0.000000e+00> : vector<8x8xf32>
    %14 = tpu.matmul %11, %12, %cst_5 {dimension_numbers = #tpu.dot_dimension_numbers<[1], [1], [0], [0], [0, 0, 1, 0], [], []>} : vector<8x16xf32>, vector<8x16xf32>, vector<8x8xf32> -> vector<8x8xf32>
    %cst_6 = arith.constant -3.40282347E+38 : f32
    %15 = vector.broadcast %cst_6 : f32 to vector<8x8xf32>
    %16 = arith.select %10, %15, %14 : vector<8x8xi1>, vector<8x8xf32>
    %cst_7 = arith.constant dense<0xFF800000> : vector<8xf32>
    %17 = vector.multi_reduction <maximumf>, %16, %cst_7 [1] : vector<8x8xf32> to vector<8xf32>
    %18 = vector.shape_cast %17 : vector<8xf32> to vector<8x1xf32>
    %19 = vector.broadcast %18 : vector<8x1xf32> to vector<8x8xf32>
    %20 = arith.subf %16, %19 : vector<8x8xf32>
    %21 = math.exp %20 : vector<8x8xf32>
    %cst_8 = arith.constant dense<0.000000e+00> : vector<8xf32>
    %22 = vector.multi_reduction <add>, %21, %cst_8 [1] : vector<8x8xf32> to vector<8xf32>
    %23 = vector.shape_cast %22 : vector<8xf32> to vector<8x1xf32>
    %24 = tpu.reciprocal %23 : vector<8x1xf32> -> vector<8x1xf32>
    %25 = vector.broadcast %24 : vector<8x1xf32> to vector<8x8xf32>
    %26 = arith.mulf %21, %25 : vector<8x8xf32>
    %cst_9 = arith.constant dense<0.000000e+00> : vector<8x16xf32>
    %27 = tpu.matmul %26, %13, %cst_9 {dimension_numbers = #tpu.dot_dimension_numbers<[1], [0], [0], [1], [0, 0, 1, 1], [], []>} : vector<8x8xf32>, vector<8x16xf32>, vector<8x16xf32> -> vector<8x16xf32>
    %c0_10 = arith.constant 0 : index
    %c0_11 = arith.constant 0 : index
    %28 = vector.load %arg6[%c0_10, %c0_11] : memref<16x64xf32, #tpu.memory_space<vmem>>, vector<8x16xf32>
    tpu.vector_store %arg6[%c0_10, %c0_11], %27 {strides = array<i32>} : memref<16x64xf32, #tpu.memory_space<vmem>>, vector<8x16xf32>,
    %29 = vector.extract_strided_slice %7 {offsets = [0, 16], sizes = [8, 16], strides = [1, 1]} : vector<16x64xf32> to vector<8x16xf32>
    %30 = vector.extract_strided_slice %2 {offsets = [0, 80], sizes = [8, 16], strides = [1, 1]} : vector<16x192xf32> to vector<8x16xf32>
    %31 = vector.extract_strided_slice %2 {offsets = [0, 144], sizes = [8, 16], strides = [1, 1]} : vector<16x192xf32> to vector<8x16xf32>
    %cst_12 = arith.constant dense<0.000000e+00> : vector<8x8xf32>
    %32 = tpu.matmul %29, %30, %cst_12 {dimension_numbers = #tpu.dot_dimension_numbers<[1], [1], [0], [0], [0, 0, 1, 0], [], []>} : vector<8x16xf32>, vector<8x16xf32>, vector<8x8xf32> -> vector<8x8xf32>
    %cst_13 = arith.constant -3.40282347E+38 : f32
    %33 = vector.broadcast %cst_13 : f32 to vector<8x8xf32>
    %34 = arith.select %10, %33, %32 : vector<8x8xi1>, vector<8x8xf32>
    %cst_14 = arith.constant dense<0xFF800000> : vector<8xf32>
    %35 = vector.multi_reduction <maximumf>, %34, %cst_14 [1] : vector<8x8xf32> to vector<8xf32>
    %36 = vector.shape_cast %35 : vector<8xf32> to vector<8x1xf32>
    %37 = vector.broadcast %36 : vector<8x1xf32> to vector<8x8xf32>
    %38 = arith.subf %34, %37 : vector<8x8xf32>
    %39 = math.exp %38 : vector<8x8xf32>
    %cst_15 = arith.constant dense<0.000000e+00> : vector<8xf32>
    %40 = vector.multi_reduction <add>, %39, %cst_15 [1] : vector<8x8xf32> to vector<8xf32>
    %41 = vector.shape_cast %40 : vector<8xf32> to vector<8x1xf32>
    %42 = tpu.reciprocal %41 : vector<8x1xf32> -> vector<8x1xf32>
    %43 = vector.broadcast %42 : vector<8x1xf32> to vector<8x8xf32>
    %44 = arith.mulf %39, %43 : vector<8x8xf32>
    %cst_16 = arith.constant dense<0.000000e+00> : vector<8x16xf32>
    %45 = tpu.matmul %44, %31, %cst_16 {dimension_numbers = #tpu.dot_dimension_numbers<[1], [0], [0], [1], [0, 0, 1, 1], [], []>} : vector<8x8xf32>, vector<8x16xf32>, vector<8x16xf32> -> vector<8x16xf32>
    %c0_17 = arith.constant 0 : index
    %c16 = arith.constant 16 : index
    %46 = vector.load %arg6[%c0_17, %c16] : memref<16x64xf32, #tpu.memory_space<vmem>>, vector<8x16xf32>
    tpu.vector_store %arg6[%c0_17, %c16], %45 {strides = array<i32>} : memref<16x64xf32, #tpu.memory_space<vmem>>, vector<8x16xf32>,
    %47 = vector.extract_strided_slice %7 {offsets = [0, 32], sizes = [8, 16], strides = [1, 1]} : vector<16x64xf32> to vector<8x16xf32>
    %48 = vector.extract_strided_slice %2 {offsets = [0, 96], sizes = [8, 16], strides = [1, 1]} : vector<16x192xf32> to vector<8x16xf32>
    %49 = vector.extract_strided_slice %2 {offsets = [0, 160], sizes = [8, 16], strides = [1, 1]} : vector<16x192xf32> to vector<8x16xf32>
    %cst_18 = arith.constant dense<0.000000e+00> : vector<8x8xf32>
    %50 = tpu.matmul %47, %48, %cst_18 {dimension_numbers = #tpu.dot_dimension_numbers<[1], [1], [0], [0], [0, 0, 1, 0], [], []>} : vector<8x16xf32>, vector<8x16xf32>, vector<8x8xf32> -> vector<8x8xf32>
    %cst_19 = arith.constant -3.40282347E+38 : f32
    %51 = vector.broadcast %cst_19 : f32 to vector<8x8xf32>
    %52 = arith.select %10, %51, %50 : vector<8x8xi1>, vector<8x8xf32>
    %cst_20 = arith.constant dense<0xFF800000> : vector<8xf32>
    %53 = vector.multi_reduction <maximumf>, %52, %cst_20 [1] : vector<8x8xf32> to vector<8xf32>
    %54 = vector.shape_cast %53 : vector<8xf32> to vector<8x1xf32>
    %55 = vector.broadcast %54 : vector<8x1xf32> to vector<8x8xf32>
    %56 = arith.subf %52, %55 : vector<8x8xf32>
    %57 = math.exp %56 : vector<8x8xf32>
    %cst_21 = arith.constant dense<0.000000e+00> : vector<8xf32>
    %58 = vector.multi_reduction <add>, %57, %cst_21 [1] : vector<8x8xf32> to vector<8xf32>
    %59 = vector.shape_cast %58 : vector<8xf32> to vector<8x1xf32>
    %60 = tpu.reciprocal %59 : vector<8x1xf32> -> vector<8x1xf32>
    %61 = vector.broadcast %60 : vector<8x1xf32> to vector<8x8xf32>
    %62 = arith.mulf %57, %61 : vector<8x8xf32>
    %cst_22 = arith.constant dense<0.000000e+00> : vector<8x16xf32>
    %63 = tpu.matmul %62, %49, %cst_22 {dimension_numbers = #tpu.dot_dimension_numbers<[1], [0], [0], [1], [0, 0, 1, 1], [], []>} : vector<8x8xf32>, vector<8x16xf32>, vector<8x16xf32> -> vector<8x16xf32>
    %c0_23 = arith.constant 0 : index
    %c32 = arith.constant 32 : index
    %64 = vector.load %arg6[%c0_23, %c32] : memref<16x64xf32, #tpu.memory_space<vmem>>, vector<8x16xf32>
    tpu.vector_store %arg6[%c0_23, %c32], %63 {strides = array<i32>} : memref<16x64xf32, #tpu.memory_space<vmem>>, vector<8x16xf32>,
    %65 = vector.extract_strided_slice %7 {offsets = [0, 48], sizes = [8, 16], strides = [1, 1]} : vector<16x64xf32> to vector<8x16xf32>
    %66 = vector.extract_strided_slice %2 {offsets = [0, 112], sizes = [8, 16], strides = [1, 1]} : vector<16x192xf32> to vector<8x16xf32>
    %67 = vector.extract_strided_slice %2 {offsets = [0, 176], sizes = [8, 16], strides = [1, 1]} : vector<16x192xf32> to vector<8x16xf32>
    %cst_24 = arith.constant dense<0.000000e+00> : vector<8x8xf32>
    %68 = tpu.matmul %65, %66, %cst_24 {dimension_numbers = #tpu.dot_dimension_numbers<[1], [1], [0], [0], [0, 0, 1, 0], [], []>} : vector<8x16xf32>, vector<8x16xf32>, vector<8x8xf32> -> vector<8x8xf32>
    %cst_25 = arith.constant -3.40282347E+38 : f32
    %69 = vector.broadcast %cst_25 : f32 to vector<8x8xf32>
    %70 = arith.select %10, %69, %68 : vector<8x8xi1>, vector<8x8xf32>
    %cst_26 = arith.constant dense<0xFF800000> : vector<8xf32>
    %71 = vector.multi_reduction <maximumf>, %70, %cst_26 [1] : vector<8x8xf32> to vector<8xf32>
    %72 = vector.shape_cast %71 : vector<8xf32> to vector<8x1xf32>
    %73 = vector.broadcast %72 : vector<8x1xf32> to vector<8x8xf32>
    %74 = arith.subf %70, %73 : vector<8x8xf32>
    %75 = math.exp %74 : vector<8x8xf32>
    %cst_27 = arith.constant dense<0.000000e+00> : vector<8xf32>
    %76 = vector.multi_reduction <add>, %75, %cst_27 [1] : vector<8x8xf32> to vector<8xf32>
    %77 = vector.shape_cast %76 : vector<8xf32> to vector<8x1xf32>
    %78 = tpu.reciprocal %77 : vector<8x1xf32> -> vector<8x1xf32>
    %79 = vector.broadcast %78 : vector<8x1xf32> to vector<8x8xf32>
    %80 = arith.mulf %75, %79 : vector<8x8xf32>
    %cst_28 = arith.constant dense<0.000000e+00> : vector<8x16xf32>
    %81 = tpu.matmul %80, %67, %cst_28 {dimension_numbers = #tpu.dot_dimension_numbers<[1], [0], [0], [1], [0, 0, 1, 1], [], []>} : vector<8x8xf32>, vector<8x16xf32>, vector<8x16xf32> -> vector<8x16xf32>
    %c0_29 = arith.constant 0 : index
    %c48 = arith.constant 48 : index
    %82 = vector.load %arg6[%c0_29, %c48] : memref<16x64xf32, #tpu.memory_space<vmem>>, vector<8x16xf32>
    tpu.vector_store %arg6[%c0_29, %c48], %81 {strides = array<i32>} : memref<16x64xf32, #tpu.memory_space<vmem>>, vector<8x16xf32>,
    %83 = vector.extract_strided_slice %7 {offsets = [8, 0], sizes = [8, 16], strides = [1, 1]} : vector<16x64xf32> to vector<8x16xf32>
    %84 = vector.extract_strided_slice %2 {offsets = [8, 64], sizes = [8, 16], strides = [1, 1]} : vector<16x192xf32> to vector<8x16xf32>
    %85 = vector.extract_strided_slice %2 {offsets = [8, 128], sizes = [8, 16], strides = [1, 1]} : vector<16x192xf32> to vector<8x16xf32>
    %cst_30 = arith.constant dense<0.000000e+00> : vector<8x8xf32>
    %86 = tpu.matmul %83, %84, %cst_30 {dimension_numbers = #tpu.dot_dimension_numbers<[1], [1], [0], [0], [0, 0, 1, 0], [], []>} : vector<8x16xf32>, vector<8x16xf32>, vector<8x8xf32> -> vector<8x8xf32>
    %cst_31 = arith.constant -3.40282347E+38 : f32
    %87 = vector.broadcast %cst_31 : f32 to vector<8x8xf32>
    %88 = arith.select %10, %87, %86 : vector<8x8xi1>, vector<8x8xf32>
    %cst_32 = arith.constant dense<0xFF800000> : vector<8xf32>
    %89 = vector.multi_reduction <maximumf>, %88, %cst_32 [1] : vector<8x8xf32> to vector<8xf32>
    %90 = vector.shape_cast %89 : vector<8xf32> to vector<8x1xf32>
    %91 = vector.broadcast %90 : vector<8x1xf32> to vector<8x8xf32>
    %92 = arith.subf %88, %91 : vector<8x8xf32>
    %93 = math.exp %92 : vector<8x8xf32>
    %cst_33 = arith.constant dense<0.000000e+00> : vector<8xf32>
    %94 = vector.multi_reduction <add>, %93, %cst_33 [1] : vector<8x8xf32> to vector<8xf32>
    %95 = vector.shape_cast %94 : vector<8xf32> to vector<8x1xf32>
    %96 = tpu.reciprocal %95 : vector<8x1xf32> -> vector<8x1xf32>
    %97 = vector.broadcast %96 : vector<8x1xf32> to vector<8x8xf32>
    %98 = arith.mulf %93, %97 : vector<8x8xf32>
    %cst_34 = arith.constant dense<0.000000e+00> : vector<8x16xf32>
    %99 = tpu.matmul %98, %85, %cst_34 {dimension_numbers = #tpu.dot_dimension_numbers<[1], [0], [0], [1], [0, 0, 1, 1], [], []>} : vector<8x8xf32>, vector<8x16xf32>, vector<8x16xf32> -> vector<8x16xf32>
    %c8 = arith.constant 8 : index
    %c0_35 = arith.constant 0 : index
    %100 = vector.load %arg6[%c8, %c0_35] : memref<16x64xf32, #tpu.memory_space<vmem>>, vector<8x16xf32>
    tpu.vector_store %arg6[%c8, %c0_35], %99 {strides = array<i32>} : memref<16x64xf32, #tpu.memory_space<vmem>>, vector<8x16xf32>,
    %101 = vector.extract_strided_slice %7 {offsets = [8, 16], sizes = [8, 16], strides = [1, 1]} : vector<16x64xf32> to vector<8x16xf32>
    %102 = vector.extract_strided_slice %2 {offsets = [8, 80], sizes = [8, 16], strides = [1, 1]} : vector<16x192xf32> to vector<8x16xf32>
    %103 = vector.extract_strided_slice %2 {offsets = [8, 144], sizes = [8, 16], strides = [1, 1]} : vector<16x192xf32> to vector<8x16xf32>
    %cst_36 = arith.constant dense<0.000000e+00> : vector<8x8xf32>
    %104 = tpu.matmul %101, %102, %cst_36 {dimension_numbers = #tpu.dot_dimension_numbers<[1], [1], [0], [0], [0, 0, 1, 0], [], []>} : vector<8x16xf32>, vector<8x16xf32>, vector<8x8xf32> -> vector<8x8xf32>
    %cst_37 = arith.constant -3.40282347E+38 : f32
    %105 = vector.broadcast %cst_37 : f32 to vector<8x8xf32>
    %106 = arith.select %10, %105, %104 : vector<8x8xi1>, vector<8x8xf32>
    %cst_38 = arith.constant dense<0xFF800000> : vector<8xf32>
    %107 = vector.multi_reduction <maximumf>, %106, %cst_38 [1] : vector<8x8xf32> to vector<8xf32>
    %108 = vector.shape_cast %107 : vector<8xf32> to vector<8x1xf32>
    %109 = vector.broadcast %108 : vector<8x1xf32> to vector<8x8xf32>
    %110 = arith.subf %106, %109 : vector<8x8xf32>
    %111 = math.exp %110 : vector<8x8xf32>
    %cst_39 = arith.constant dense<0.000000e+00> : vector<8xf32>
    %112 = vector.multi_reduction <add>, %111, %cst_39 [1] : vector<8x8xf32> to vector<8xf32>
    %113 = vector.shape_cast %112 : vector<8xf32> to vector<8x1xf32>
    %114 = tpu.reciprocal %113 : vector<8x1xf32> -> vector<8x1xf32>
    %115 = vector.broadcast %114 : vector<8x1xf32> to vector<8x8xf32>
    %116 = arith.mulf %111, %115 : vector<8x8xf32>
    %cst_40 = arith.constant dense<0.000000e+00> : vector<8x16xf32>
    %117 = tpu.matmul %116, %103, %cst_40 {dimension_numbers = #tpu.dot_dimension_numbers<[1], [0], [0], [1], [0, 0, 1, 1], [], []>} : vector<8x8xf32>, vector<8x16xf32>, vector<8x16xf32> -> vector<8x16xf32>
    %c8_41 = arith.constant 8 : index
    %c16_42 = arith.constant 16 : index
    %118 = vector.load %arg6[%c8_41, %c16_42] : memref<16x64xf32, #tpu.memory_space<vmem>>, vector<8x16xf32>
    tpu.vector_store %arg6[%c8_41, %c16_42], %117 {strides = array<i32>} : memref<16x64xf32, #tpu.memory_space<vmem>>, vector<8x16xf32>,
    %119 = vector.extract_strided_slice %7 {offsets = [8, 32], sizes = [8, 16], strides = [1, 1]} : vector<16x64xf32> to vector<8x16xf32>
    %120 = vector.extract_strided_slice %2 {offsets = [8, 96], sizes = [8, 16], strides = [1, 1]} : vector<16x192xf32> to vector<8x16xf32>
    %121 = vector.extract_strided_slice %2 {offsets = [8, 160], sizes = [8, 16], strides = [1, 1]} : vector<16x192xf32> to vector<8x16xf32>
    %cst_43 = arith.constant dense<0.000000e+00> : vector<8x8xf32>
    %122 = tpu.matmul %119, %120, %cst_43 {dimension_numbers = #tpu.dot_dimension_numbers<[1], [1], [0], [0], [0, 0, 1, 0], [], []>} : vector<8x16xf32>, vector<8x16xf32>, vector<8x8xf32> -> vector<8x8xf32>
    %cst_44 = arith.constant -3.40282347E+38 : f32
    %123 = vector.broadcast %cst_44 : f32 to vector<8x8xf32>
    %124 = arith.select %10, %123, %122 : vector<8x8xi1>, vector<8x8xf32>
    %cst_45 = arith.constant dense<0xFF800000> : vector<8xf32>
    %125 = vector.multi_reduction <maximumf>, %124, %cst_45 [1] : vector<8x8xf32> to vector<8xf32>
    %126 = vector.shape_cast %125 : vector<8xf32> to vector<8x1xf32>
    %127 = vector.broadcast %126 : vector<8x1xf32> to vector<8x8xf32>
    %128 = arith.subf %124, %127 : vector<8x8xf32>
    %129 = math.exp %128 : vector<8x8xf32>
    %cst_46 = arith.constant dense<0.000000e+00> : vector<8xf32>
    %130 = vector.multi_reduction <add>, %129, %cst_46 [1] : vector<8x8xf32> to vector<8xf32>
    %131 = vector.shape_cast %130 : vector<8xf32> to vector<8x1xf32>
    %132 = tpu.reciprocal %131 : vector<8x1xf32> -> vector<8x1xf32>
    %133 = vector.broadcast %132 : vector<8x1xf32> to vector<8x8xf32>
    %134 = arith.mulf %129, %133 : vector<8x8xf32>
    %cst_47 = arith.constant dense<0.000000e+00> : vector<8x16xf32>
    %135 = tpu.matmul %134, %121, %cst_47 {dimension_numbers = #tpu.dot_dimension_numbers<[1], [0], [0], [1], [0, 0, 1, 1], [], []>} : vector<8x8xf32>, vector<8x16xf32>, vector<8x16xf32> -> vector<8x16xf32>
    %c8_48 = arith.constant 8 : index
    %c32_49 = arith.constant 32 : index
    %136 = vector.load %arg6[%c8_48, %c32_49] : memref<16x64xf32, #tpu.memory_space<vmem>>, vector<8x16xf32>
    tpu.vector_store %arg6[%c8_48, %c32_49], %135 {strides = array<i32>} : memref<16x64xf32, #tpu.memory_space<vmem>>, vector<8x16xf32>,
    %137 = vector.extract_strided_slice %7 {offsets = [8, 48], sizes = [8, 16], strides = [1, 1]} : vector<16x64xf32> to vector<8x16xf32>
    %138 = vector.extract_strided_slice %2 {offsets = [8, 112], sizes = [8, 16], strides = [1, 1]} : vector<16x192xf32> to vector<8x16xf32>
    %139 = vector.extract_strided_slice %2 {offsets = [8, 176], sizes = [8, 16], strides = [1, 1]} : vector<16x192xf32> to vector<8x16xf32>
    %cst_50 = arith.constant dense<0.000000e+00> : vector<8x8xf32>
    %140 = tpu.matmul %137, %138, %cst_50 {dimension_numbers = #tpu.dot_dimension_numbers<[1], [1], [0], [0], [0, 0, 1, 0], [], []>} : vector<8x16xf32>, vector<8x16xf32>, vector<8x8xf32> -> vector<8x8xf32>
    %cst_51 = arith.constant -3.40282347E+38 : f32
    %141 = vector.broadcast %cst_51 : f32 to vector<8x8xf32>
    %142 = arith.select %10, %141, %140 : vector<8x8xi1>, vector<8x8xf32>
    %cst_52 = arith.constant dense<0xFF800000> : vector<8xf32>
    %143 = vector.multi_reduction <maximumf>, %142, %cst_52 [1] : vector<8x8xf32> to vector<8xf32>
    %144 = vector.shape_cast %143 : vector<8xf32> to vector<8x1xf32>
    %145 = vector.broadcast %144 : vector<8x1xf32> to vector<8x8xf32>
    %146 = arith.subf %142, %145 : vector<8x8xf32>
    %147 = math.exp %146 : vector<8x8xf32>
    %cst_53 = arith.constant dense<0.000000e+00> : vector<8xf32>
    %148 = vector.multi_reduction <add>, %147, %cst_53 [1] : vector<8x8xf32> to vector<8xf32>
    %149 = vector.shape_cast %148 : vector<8xf32> to vector<8x1xf32>
    %150 = tpu.reciprocal %149 : vector<8x1xf32> -> vector<8x1xf32>
    %151 = vector.broadcast %150 : vector<8x1xf32> to vector<8x8xf32>
    %152 = arith.mulf %147, %151 : vector<8x8xf32>
    %cst_54 = arith.constant dense<0.000000e+00> : vector<8x16xf32>
    %153 = tpu.matmul %152, %139, %cst_54 {dimension_numbers = #tpu.dot_dimension_numbers<[1], [0], [0], [1], [0, 0, 1, 1], [], []>} : vector<8x8xf32>, vector<8x16xf32>, vector<8x16xf32> -> vector<8x16xf32>
    %c8_55 = arith.constant 8 : index
    %c48_56 = arith.constant 48 : index
    %154 = vector.load %arg6[%c8_55, %c48_56] : memref<16x64xf32, #tpu.memory_space<vmem>>, vector<8x16xf32>
    tpu.vector_store %arg6[%c8_55, %c48_56], %153 {strides = array<i32>} : memref<16x64xf32, #tpu.memory_space<vmem>>, vector<8x16xf32>,
    %c0_57 = arith.constant 0 : index
    %c0_58 = arith.constant 0 : index
    %155 = vector.load %arg6[%c0_57, %c0_58] : memref<16x64xf32, #tpu.memory_space<vmem>>, vector<16x64xf32>
    %c0_59 = arith.constant 0 : index
    %c0_60 = arith.constant 0 : index
    %156 = vector.load %arg3[%c0_59, %c0_60] : memref<64x32xf32, #tpu.memory_space<vmem>>, vector<64x32xf32>
    %cst_61 = arith.constant dense<0.000000e+00> : vector<16x32xf32>
    %157 = tpu.matmul %155, %156, %cst_61 {dimension_numbers = #tpu.dot_dimension_numbers<[1], [0], [0], [1], [0, 0, 1, 1], [], []>} : vector<16x64xf32>, vector<64x32xf32>, vector<16x32xf32> -> vector<16x32xf32>
    %c0_62 = arith.constant 0 : index
    %c0_63 = arith.constant 0 : index
    %158 = vector.load %arg5[%c0_62, %c0_63] : memref<16x32xf32, #tpu.memory_space<vmem>>, vector<16x32xf32>
    tpu.vector_store %arg5[%c0_62, %c0_63], %157 {strides = array<i32>} : memref<16x32xf32, #tpu.memory_space<vmem>>, vector<16x32xf32>,
    return
  }
  func.func @transform_0(%arg0: i32) -> (i32, i32) {
    %c0_i32 = arith.constant 0 : i32
    %c0_i32_0 = arith.constant 0 : i32
    return %arg0, %c0_i32 : i32, i32
  }
  func.func @transform_1(%arg0: i32) -> (i32, i32) {
    %c0_i32 = arith.constant 0 : i32
    %c0_i32_0 = arith.constant 0 : i32
    %c0_i32_1 = arith.constant 0 : i32
    return %c0_i32, %c0_i32_0 : i32, i32
  }
  func.func @transform_2(%arg0: i32) -> (i32, i32) {
    %c0_i32 = arith.constant 0 : i32
    %c0_i32_0 = arith.constant 0 : i32
    %c0_i32_1 = arith.constant 0 : i32
    return %c0_i32, %c0_i32_0 : i32, i32
  }
  func.func @transform_3(%arg0: i32) -> (i32, i32) {
    %c0_i32 = arith.constant 0 : i32
    %c0_i32_0 = arith.constant 0 : i32
    %c0_i32_1 = arith.constant 0 : i32
    return %c0_i32, %c0_i32_0 : i32, i32
  }
  func.func @transform_4(%arg0: i32) -> (i32, i32) {
    %c0_i32 = arith.constant 0 : i32
    %c0_i32_0 = arith.constant 0 : i32
    return %arg0, %c0_i32 : i32, i32
  }
}

</mosaic_0001>

<bundles_post_ra>
// kernel: tpu_custom_call.1
= control target key start
LH: loop header
LB: loop body
LE: loop exit
PB: predicated region body
PF: predicated region fallthrough
CT: control target
= control target key end

     0   :  { %v1862_v8 = vmov 0.0   ;;  %s2128_s0 = inlined_call_operand.vmem [shape: f32[16,32], index: 0, kind: input, shape index: {}]   ;;  %s2129_s1 = inlined_call_operand.vmem [shape: f32[32,192], index: 1, kind: input, shape index: {}]   ;;  %s2130_s2 = inlined_call_operand.vmem [shape: f32[64,32], index: 2, kind: input, shape index: {}]   ;;  %s2131_s3 = inlined_call_operand.<no memory space> [shape: f32[1,1], index: 3, kind: input, shape index: {}]   ;;  %s2132_s4 = inlined_call_operand.hbm [shape: f32[16,32], index: 4, kind: output, shape index: {}]  }
   0x1   :  { %v22_v0 = vld [vmem:[%s2129_s1 + $0x8] sm:$0xff]  ;;  %v24_v1 = vld [vmem:[%s2129_s1 + $0x18] sm:$0xff]  ;;  %v21_v2 = vld [vmem:[%s2129_s1] sm:$0xff]  ;;  %v114_v3 = vstv %s2131_s3  ;;  %100 = vmatprep.mubr.f32.mxu0 %v1862_v8  ;;  %1672 = vmatprep.subr.mxu1 %v1862_v8 }
   0x2   :  { %v1766_v4 = vpack.c.bf16 %v24_v1, %v22_v0  ;;  %v23_v5 = vld [vmem:[%s2129_s1 + $0x10] sm:$0xff]  ;;  %v26_v6 = vld [vmem:[%s2129_s1 + $0x28] sm:$0xff]  ;;  %v28_v7 = vld [vmem:[%s2129_s1 + $0x38] sm:$0xff]  ;;  %v115_v9 = vmul.f32 1.442695, %v114_v3 }
   0x3   :  { %v1768_v10 = vpack.c.bf16 %v23_v5, %v21_v2  ;;  %v1770_v11 = vpack.c.bf16 %v28_v7, %v26_v6  ;;  %v25_v12 = vld [vmem:[%s2129_s1 + $0x20] sm:$0xff]  ;;  %v27_v13 = vld [vmem:[%s2129_s1 + $0x30] sm:$0xff] }
   0x4   :  { %1767 = vmatprep.subr.bf16.mxu0 %v1766_v4  ;;  %1804 = vpow2.f32 %v115_v9 }
   0x5   :  { %10 = vsyncpa [#allocation5], 0  ;;  %1769 = vmatpush1.bf16.msra.mxu0 %v1768_v10  ;;  %v1772_v14 = vpack.c.bf16 %v27_v13, %v25_v12  ;;  %v19_v15 = vld [vmem:[%s2128_s0] sm:$0xff]  ;;  %vm29_vm0 = vcmask 261120   ;;  %v20_v16 = vld [vmem:[%s2128_s0 + $0x8] sm:$0xff]  ;;  %vm1863_vm1 = vmmov 0   ;;  %v121_v26 = vlaneseq }
   0x6   :  { %1771 = vmatprep.subr.bf16.mxu0 %v1770_v11  ;;  %1674 = vmatprep.mubr.msk.f32.mxu1 %vm1863_vm1, %v1862_v8  ;;  %s1864_s10 = smov 48   ;;  %s1865_s11 = smov 64   ;;  %vm129_vm2 = vcmask 130048   ;;  %vm206_vm4 = vcmask 64512   ;;  %vm463_vm5 = vcmask 261248   ;;  %vm635_vm6 = vcmask 392448  }
   0x7   :  { %s1866_s0 = smov 112   ;;  %s1867_s12 = smov 32   ;;  %v122_v27 = vshrl.u32 %v121_v26, 7  ;;  %v124_v28 = vand.u32 127, %v121_v26  ;;  %vm807_vm7 = vcmask 523648   ;;  %vm1497_vm8 = vcmask 523264  }
   0x8   :  { %s1868_s13 = smov 96   ;;  %s1869_s14 = smov 16  }
   0x9   :  { %1773 = vmatpush1.bf16.msra.mxu0 %v1772_v14  ;;  %vm1961_vm3 = vcmp.eq.s32.totalorder %v122_v27, %v124_v28  ;;  %s1870_s15 = smov 80  }
   0xa   :  { %1667 = vmatprep.subr.mxu0 %v1862_v8 }
   0xc   :  { %1597 = vmatmul.mubr.msk.f32.vlgmr.msra.gmra.mrb[0].mxu0 %vm29_vm0, %v19_v15 }
   0xd   :  { %106 = vmatprep.mubr.f32.mxu0 %v1862_v8 }
   0xe   :  { %v1805_v17 = vpop.eup %1804 }
   0xf   :  { %1790 = vpush %v1805_v17 }
  0x10   :  { %1598 = vmatmul.mubr.msk.f32.gmra.mrb[2].mxu0 %vm29_vm0, %v20_v16 }
  0x11   :  { %1669 = vmatprep.mubr.msk.f32.mxu0 %vm1863_vm1, %v1862_v8 }
  0x40   :  { %s1791_s9 = spop %1790 }
  0x41   :  { %v118_v18 = vstv %s1791_s9 }
  0xdf   :  { %v102_v19 = vpop.f32.mrb[0].mxu0 }
  0xe0   :  { %294 = vrot.lane.b32.xlu1 %v102_v19, %s1864_s10  ;;  %127 = vrot.lane.b32.xlu0 %v102_v19, %s1865_s11  ;;  %v1944_v20 = vpop.f32.mrb[1].mxu0  ;;  %v119_v21 = vmul.f32 %v118_v18, %v102_v19 }
  0xe1   :  { %1673 = vmatpush3.msra.mxu1 %v1944_v20 }
  0xe2   :  { %1677 = vmatprep.subr.mxu1 %v1862_v8 }
  0xe3   :  { %v108_v22 = vpop.f32.mrb[2].mxu0 }
  0xe4   :  { %292 = vrot.lane.b32.xlu1 %v119_v21, %s1866_s0  ;;  %v1949_v23 = vpop.f32.mrb[3].mxu0  ;;  %v1951_v24 = vmul.f32 %v118_v18, %v108_v22 }
  0xe8   :  { %467 = vrot.lane.b32.xlu1 %v102_v19, %s1867_s12 }
  0xec   :  { %465 = vrot.lane.b32.xlu1 %v119_v21, %s1868_s13 }
  0xf0   :  { %639 = vrot.lane.b32.xlu1 %v102_v19, %s1869_s14 }
 0x152   :  { %v128_v25 = vpop.permute.xlu0 %127  ;;  %v295_v39 = vpop.permute.xlu1 %294 }
 0x153   :  { %1668 = vmatpush3.xpose.msk.msra.mxu0 %vm129_vm2, %v128_v25 }
 0x154   :  { %1682 = vmatprep.subr.mxu0 %v1862_v8 }
 0x156   :  { %1670 = vmatmul.mubr.msk.f32.vlgmr.msra.gmra.mrb[4].mxu0 %vm129_vm2, %v119_v21  ;;  %v293_v40 = vpop.permute.xlu1 %292 }
 0x157   :  { %1684 = vmatprep.mubr.msk.f32.mxu0 %vm1863_vm1, %v1862_v8 }
 0x15a   :  { %v468_v41 = vpop.permute.xlu1 %467 }
 0x15e   :  { %v466_v42 = vpop.permute.xlu1 %465 }
 0x162   :  { %v640_v43 = vpop.permute.xlu1 %639 }
 0x229   :  { %v201_v30 = vpop.f32.mrb[4].mxu0 }
 0x22a   :  { %v205_v31 = vsel %vm1961_vm3, -3.4028235e+38, %v201_v30  ;;  %v1671_v32 = vpop.f32.mrb[5].mxu0 }
 0x22b   :  { %v207_v33 = vsel %vm206_vm4, %v205_v31, -inf }
 0x22c   :  { %208 = vmax.xlane.f32.xlu0 %v207_v33 }
 0x242   :  { %637 = vrot.lane.b32.xlu0 %v119_v21, %s1870_s15 }
 0x246   :  { %1318 = vrot.lane.b32.xlu0 %v108_v22, %s1869_s14 }
 0x2b9   :  { %v209_v34 = vpop.xlane.xlu0 %208 }
 0x2ba   :  { %v210_v35 = vsub.f32 %v205_v31, %v209_v34 }
 0x2bc   :  { %v211_v36 = vmul.f32 1.442695, %v210_v35 }
 0x2bd   :  { %v638_v50 = vpop.permute.xlu0 %637 }
 0x2be   :  { %1806 = vpow2.f32 %v211_v36 }
 0x2c1   :  { %v1319_v53 = vpop.permute.xlu0 %1318 }
 0x2c8   :  { %v1807_v37 = vpop.eup %1806 }
 0x2c9   :  { %v213_v38 = vsel %vm206_vm4, %v1807_v37, 0.0 }
 0x2ca   :  { %214 = vadd.xlane.f32.xlu1 %v213_v38 }
 0x2db   :  { %810 = vrot.lane.b32.xlu1 %v108_v22, %s1865_s11 }
 0x2df   :  { %975 = vrot.lane.b32.xlu1 %v108_v22, %s1864_s10 }
 0x2e3   :  { %973 = vrot.lane.b32.xlu1 %v1951_v24, %s1866_s0 }
 0x2e7   :  { %1147 = vrot.lane.b32.xlu1 %v108_v22, %s1867_s12 }
 0x2eb   :  { %1145 = vrot.lane.b32.xlu1 %v1951_v24, %s1868_s13 }
 0x2ef   :  { %1316 = vrot.lane.b32.xlu1 %v1951_v24, %s1870_s15 }
 0x357   :  { %v215_v44 = vpop.xlane.xlu1 %214 }
 0x358   :  { %1808 = vrcp.f32 %v215_v44 }
 0x35b   :  { %v811_v46 = vpop.permute.xlu1 %810 }
 0x35f   :  { %v976_v48 = vpop.permute.xlu1 %975 }
 0x362   :  { %v1809_v45 = vpop.eup %1808 }
 0x363   :  { %v217_v47 = vmul.f32 %v1809_v45, %v1807_v37  ;;  %v974_v49 = vpop.permute.xlu1 %973 }
 0x365   :  { %1675 = vmatmul.mubr.msk.f32.vlgmr.msra.gmra.mrb[0].mxu1 %vm206_vm4, %v217_v47 }
 0x366   :  { %1678 = vmatpush3.xpose.msk.msra.mxu1 %vm129_vm2, %v295_v39  ;;  %1679 = vmatprep.mubr.msk.f32.mxu1 %vm1863_vm1, %v1862_v8 }
 0x367   :  { %1687 = vmatprep.subr.mxu1 %v1862_v8  ;;  %v1148_v51 = vpop.permute.xlu1 %1147 }
 0x369   :  { %1680 = vmatmul.mubr.msk.f32.vlgmr.msra.gmra.mrb[2].mxu1 %vm129_vm2, %v293_v40 }
 0x36a   :  { %1688 = vmatpush3.xpose.msk.msra.mxu1 %vm129_vm2, %v468_v41  ;;  %1689 = vmatprep.mubr.msk.f32.mxu1 %vm1863_vm1, %v1862_v8 }
 0x36b   :  { %1697 = vmatprep.subr.mxu1 %v1862_v8  ;;  %v1146_v52 = vpop.permute.xlu1 %1145 }
 0x36d   :  { %1690 = vmatmul.mubr.msk.f32.vlgmr.msra.gmra.mrb[4].mxu1 %vm129_vm2, %v466_v42 }
 0x36e   :  { %1698 = vmatpush3.xpose.msk.msra.mxu1 %vm129_vm2, %v640_v43  ;;  %1699 = vmatprep.mubr.msk.f32.mxu1 %vm1863_vm1, %v1862_v8 }
 0x36f   :  { %1707 = vmatprep.subr.mxu1 %v1862_v8  ;;  %v1317_v54 = vpop.permute.xlu1 %1316 }
 0x371   :  { %1700 = vmatmul.mubr.msk.f32.vlgmr.msra.gmra.mrb[6].mxu1 %vm129_vm2, %v638_v50 }
 0x372   :  { %1708 = vmatpush3.xpose.msk.msra.mxu1 %vm129_vm2, %v811_v46  ;;  %1709 = vmatprep.mubr.msk.f32.mxu1 %vm1863_vm1, %v1862_v8 }
 0x373   :  { %1717 = vmatprep.subr.mxu1 %v1862_v8 }
 0x375   :  { %1710 = vmatmul.mubr.msk.f32.vlgmr.msra.gmra.mrb[8].mxu1 %vm129_vm2, %v1951_v24 }
 0x376   :  { %1718 = vmatpush3.xpose.msk.msra.mxu1 %vm129_vm2, %v976_v48  ;;  %1719 = vmatprep.mubr.msk.f32.mxu1 %vm1863_vm1, %v1862_v8 }
 0x377   :  { %1727 = vmatprep.subr.mxu1 %v1862_v8 }
 0x379   :  { %1720 = vmatmul.mubr.msk.f32.vlgmr.msra.gmra.mrb[10].mxu1 %vm129_vm2, %v974_v49 }
 0x37a   :  { %1728 = vmatpush3.xpose.msk.msra.mxu1 %vm129_vm2, %v1148_v51  ;;  %1729 = vmatprep.mubr.msk.f32.mxu1 %vm1863_vm1, %v1862_v8 }
 0x37b   :  { %1737 = vmatprep.subr.mxu1 %v1862_v8 }
 0x37d   :  { %1730 = vmatmul.mubr.msk.f32.vlgmr.msra.gmra.mrb[12].mxu1 %vm129_vm2, %v1146_v52 }
 0x37e   :  { %1738 = vmatpush3.xpose.msk.msra.mxu1 %vm129_vm2, %v1319_v53  ;;  %1739 = vmatprep.mubr.msk.f32.mxu1 %vm1863_vm1, %v1862_v8 }
 0x381   :  { %1740 = vmatmul.mubr.msk.f32.vlgmr.msra.gmra.mrb[14].mxu1 %vm129_vm2, %v1317_v54 }
 0x438   :  { %v287_v55 = vpop.f32.mrb[0].mxu1 }
 0x439   :  { %291 = vst.msk [vmem:[#allocation2] sm:$0xff] %vm129_vm2, %v287_v55  ;;  %v1676_v56 = vpop.f32.mrb[1].mxu1 }
 0x43c   :  { %v366_v57 = vpop.f32.mrb[2].mxu1 }
 0x43d   :  { %v370_v58 = vsel %vm1961_vm3, -3.4028235e+38, %v366_v57  ;;  %v1681_v59 = vpop.f32.mrb[3].mxu1 }
 0x43e   :  { %v371_v60 = vsel %vm206_vm4, %v370_v58, -inf }
 0x43f   :  { %372 = vmax.xlane.f32.xlu0 %v371_v60 }
 0x440   :  { %v539_v61 = vpop.f32.mrb[4].mxu1 }
 0x441   :  { %v543_v62 = vsel %vm1961_vm3, -3.4028235e+38, %v539_v61  ;;  %v1691_v63 = vpop.f32.mrb[5].mxu1 }
 0x442   :  { %v544_v0 = vsel %vm206_vm4, %v543_v62, -inf }
 0x443   :  { %545 = vmax.xlane.f32.xlu1 %v544_v0 }
 0x444   :  { %v711_v1 = vpop.f32.mrb[6].mxu1 }
 0x445   :  { %v715_v2 = vsel %vm1961_vm3, -3.4028235e+38, %v711_v1  ;;  %v1701_v3 = vpop.f32.mrb[7].mxu1 }
 0x446   :  { %v716_v4 = vsel %vm206_vm4, %v715_v2, -inf }
 0x447   :  { %717 = vmax.xlane.f32.xlu0 %v716_v4 }
 0x448   :  { %v883_v5 = vpop.f32.mrb[8].mxu1 }
 0x449   :  { %v887_v6 = vsel %vm1961_vm3, -3.4028235e+38, %v883_v5  ;;  %v1711_v7 = vpop.f32.mrb[9].mxu1 }
 0x44a   :  { %v888_v9 = vsel %vm206_vm4, %v887_v6, -inf }
 0x44b   :  { %889 = vmax.xlane.f32.xlu0 %v888_v9 }
 0x44c   :  { %v1047_v10 = vpop.f32.mrb[10].mxu1 }
 0x44d   :  { %v1051_v11 = vsel %vm1961_vm3, -3.4028235e+38, %v1047_v10  ;;  %v1721_v12 = vpop.f32.mrb[11].mxu1 }
 0x44e   :  { %v1052_v13 = vsel %vm206_vm4, %v1051_v11, -inf }
 0x44f   :  { %1053 = vmax.xlane.f32.xlu1 %v1052_v13 }
 0x450   :  { %v1219_v14 = vpop.f32.mrb[12].mxu1 }
 0x451   :  { %v1223_v15 = vsel %vm1961_vm3, -3.4028235e+38, %v1219_v14  ;;  %v1731_v16 = vpop.f32.mrb[13].mxu1 }
 0x452   :  { %v1224_v17 = vsel %vm206_vm4, %v1223_v15, -inf }
 0x453   :  { %1225 = vmax.xlane.f32.xlu0 %v1224_v17 }
 0x454   :  { %v1390_v18 = vpop.f32.mrb[14].mxu1 }
 0x455   :  { %v1741_v19 = vpop.f32.mrb[15].mxu1  ;;  %v1394_v21 = vsel %vm1961_vm3, -3.4028235e+38, %v1390_v18 }
 0x456   :  { %v1395_v22 = vsel %vm206_vm4, %v1394_v21, -inf }
 0x460   :  { %383 = vrot.lane.b32.xlu1 %v1944_v20, %s1866_s0 }
 0x484   :  { %1396 = vmax.xlane.f32.xlu1 %v1395_v22 }
 0x495   :  { %727 = vrot.lane.b32.xlu1 %v1944_v20, %s1870_s15 }
 0x4cc   :  { %v373_v24 = vpop.xlane.xlu0 %372 }
 0x4cd   :  { %v374_v25 = vsub.f32 %v370_v58, %v373_v24 }
 0x4cf   :  { %v375_v26 = vmul.f32 1.442695, %v374_v25 }
 0x4d0   :  { %v546_v27 = vpop.xlane.xlu1 %545 }
 0x4d1   :  { %1810 = vpow2.f32 %v375_v26  ;;  %v547_v28 = vsub.f32 %v543_v62, %v546_v27  ;;  %v1489_v27 = vld [vmem:[%s2130_s2] sm:$0xff] }
 0x4d3   :  { %v548_v30 = vmul.f32 1.442695, %v547_v28  ;;  %v1490_v28 = vld [vmem:[%s2130_s2 + $0x8] sm:$0xff] }
 0x4d4   :  { %v718_v36 = vpop.xlane.xlu0 %717 }
 0x4d5   :  { %1812 = vpow2.f32 %v548_v30  ;;  %v719_v37 = vsub.f32 %v715_v2, %v718_v36  ;;  %v1491_v30 = vld [vmem:[%s2130_s2 + $0x10] sm:$0xff] }
 0x4d7   :  { %v720_v40 = vmul.f32 1.442695, %v719_v37 }
 0x4d8   :  { %v890_v38 = vpop.xlane.xlu0 %889 }
 0x4d9   :  { %v891_v39 = vsub.f32 %v887_v6, %v890_v38  ;;  %1814 = vpow2.f32 %v720_v40  ;;  %v1495_v38 = vld [vmem:[%s2130_s2 + $0x30] sm:$0xff] }
 0x4db   :  { %v1811_v31 = vpop.eup %1810  ;;  %v892_v43 = vmul.f32 1.442695, %v891_v39  ;;  %v1496_v39 = vld [vmem:[%s2130_s2 + $0x38] sm:$0xff] }
 0x4dc   :  { %v1054_v32 = vpop.xlane.xlu1 %1053  ;;  %v377_v33 = vsel %vm206_vm4, %v1811_v31, 0.0 }
 0x4dd   :  { %378 = vadd.xlane.f32.xlu0 %v377_v33  ;;  %v1055_v41 = vsub.f32 %v1051_v11, %v1054_v32  ;;  %1816 = vpow2.f32 %v892_v43 }
 0x4df   :  { %v1813_v29 = vpop.eup %1812  ;;  %v1056_v44 = vmul.f32 1.442695, %v1055_v41  ;;  %v1786_v41 = vpack.c.bf16 %v1496_v39, %v1495_v38 }
 0x4e0   :  { %v384_v34 = vpop.permute.xlu1 %383  ;;  %v550_v35 = vsel %vm206_vm4, %v1813_v29, 0.0  ;;  %v1226_v42 = vpop.xlane.xlu0 %1225 }
 0x4e1   :  { %1683 = vmatpush3.msra.mxu0 %v384_v34  ;;  %551 = vadd.xlane.f32.xlu1 %v550_v35  ;;  %v1227_v45 = vsub.f32 %v1223_v15, %v1226_v42  ;;  %1818 = vpow2.f32 %v1056_v44  ;;  %v1493_v34 = vld [vmem:[%s2130_s2 + $0x20] sm:$0xff]  ;;  %v1494_v35 = vld [vmem:[%s2130_s2 + $0x28] sm:$0xff] }
 0x4e2   :  { %1692 = vmatprep.subr.mxu0 %v1862_v8  ;;  %v1782_v36 = vpack.c.bf16 %v1494_v35, %v1493_v34 }
 0x4e3   :  { %v1228_v46 = vmul.f32 1.442695, %v1227_v45  ;;  %v1815_v47 = vpop.eup %1814 }
 0x4e5   :  { %1820 = vpow2.f32 %v1228_v46 }
 0x4e7   :  { %v1817_v48 = vpop.eup %1816 }
 0x4e8   :  { %v894_v54 = vsel %vm206_vm4, %v1817_v48, 0.0 }
 0x4eb   :  { %v1819_v50 = vpop.eup %1818 }
 0x4ec   :  { %v1058_v53 = vsel %vm206_vm4, %v1819_v50, 0.0 }
 0x4ef   :  { %v1821_v55 = vpop.eup %1820 }
 0x4f0   :  { %v1230_v56 = vsel %vm206_vm4, %v1821_v55, 0.0 }
 0x4f2   :  { %1064 = vrot.lane.b32.xlu1 %v1949_v23, %s1866_s0 }
 0x4f3   :  { %555 = vrot.lane.b32.xlu0 %v1944_v20, %s1868_s13  ;;  %v722_v20 = vsel %vm206_vm4, %v1815_v47, 0.0 }
 0x511   :  { %v1397_v49 = vpop.xlane.xlu1 %1396 }
 0x512   :  { %v1398_v51 = vsub.f32 %v1394_v21, %v1397_v49  ;;  %723 = vadd.xlane.f32.xlu0 %v722_v20 }
 0x514   :  { %v1399_v52 = vmul.f32 1.442695, %v1398_v51 }
 0x515   :  { %v728_v59 = vpop.permute.xlu1 %727 }
 0x516   :  { %1822 = vpow2.f32 %v1399_v52  ;;  %1059 = vadd.xlane.f32.xlu0 %v1058_v53  ;;  %895 = vadd.xlane.f32.xlu1 %v894_v54 }
 0x51a   :  { %1231 = vadd.xlane.f32.xlu1 %v1230_v56 }
 0x520   :  { %v1823_v57 = vpop.eup %1822 }
 0x521   :  { %v1401_v58 = vsel %vm206_vm4, %v1823_v57, 0.0 }
 0x522   :  { %1402 = vadd.xlane.f32.xlu0 %v1401_v58 }
 0x52b   :  { %1406 = vrot.lane.b32.xlu1 %v1949_v23, %s1870_s15 }
 0x538   :  { %1235 = vrot.lane.b32.xlu0 %v1949_v23, %s1868_s13 }
 0x56a   :  { %v379_v60 = vpop.xlane.xlu0 %378 }
 0x56b   :  { %1824 = vrcp.f32 %v379_v60 }
 0x56e   :  { %v552_v61 = vpop.xlane.xlu1 %551  ;;  %v556_v0 = vpop.permute.xlu0 %555 }
 0x56f   :  { %1826 = vrcp.f32 %v552_v61 }
 0x572   :  { %v1065_v3 = vpop.permute.xlu1 %1064 }
 0x575   :  { %v1825_v62 = vpop.eup %1824 }
 0x576   :  { %v381_v63 = vmul.f32 %v1825_v62, %v1811_v31  ;;  %v1492_v31 = vld [vmem:[%s2130_s2 + $0x18] sm:$0xff]  ;;  %s1871_s2 = smov [#allocation4]  }
 0x577   :  { %v1778_v32 = vpack.c.bf16 %v1492_v31, %v1491_v30  ;;  %s1586_s5 = sshll.u32 %s1871_s2, 4  ;;  %s1587_s5 = int_to_ptr.vmem [resolvable:$true] %s1586_s5 }
 0x578   :  { %1685 = vmatmul.mubr.msk.f32.vlgmr.msra.gmra.mrb[6].mxu0 %vm206_vm4, %v381_v63  ;;  %s1838_s6 = scalar_lea.vmem %s1587_s5, 256  ;;  %p1843_p1 = scmp.lt.s32.totalorder %s1587_s5, %s1587_s5 }
 0x579   :  { %v1827_v1 = vpop.eup %1826  ;;  %1693 = vmatpush3.msra.mxu0 %v556_v0  ;;  %1694 = vmatprep.mubr.msk.f32.mxu0 %vm1863_vm1, %v1862_v8  ;;  %p1839_p0 = scmp.ne.s32.totalorder %s1587_s5, %s1838_s6  ;;  %p1844_p2 = scmp.lt.s32.totalorder %s1838_s6, %s1838_s6 }
 0x57a   :  { %v554_v2 = vmul.f32 %v1827_v1, %v1813_v29  ;;  %1702 = vmatprep.subr.mxu0 %v1862_v8 }
 0x57b   :  { %p1845_p3 = por %p1844_p2, %p1843_p1 }
 0x57c   :  { %1695 = vmatmul.mubr.msk.f32.vlgmr.msra.gmra.mrb[8].mxu0 %vm206_vm4, %v554_v2 }
 0x57d   :  { %1703 = vmatpush3.msra.mxu0 %v728_v59  ;;  %1704 = vmatprep.mubr.msk.f32.mxu0 %vm1863_vm1, %v1862_v8  ;;  %p1846_p4 = pnand %p1845_p3, %p1839_p0 }
 0x57e   :  { %1712 = vmatprep.subr.mxu0 %v1862_v8 }
 0x59f   :  { %v724_v4 = vpop.xlane.xlu0 %723 }
 0x5a0   :  { %1828 = vrcp.f32 %v724_v4 }
 0x5a3   :  { %v896_v5 = vpop.xlane.xlu1 %895  ;;  %v1060_v6 = vpop.xlane.xlu0 %1059 }
 0x5a4   :  { %1830 = vrcp.f32 %v896_v5 }
 0x5a5   :  { %1832 = vrcp.f32 %v1060_v6 }
 0x5a7   :  { %v1232_v7 = vpop.xlane.xlu1 %1231 }
 0x5a8   :  { %1834 = vrcp.f32 %v1232_v7 }
 0x5aa   :  { %v1829_v9 = vpop.eup %1828 }
 0x5ab   :  { %v726_v10 = vmul.f32 %v1829_v9, %v1815_v47  ;;  %v1407_v18 = vpop.permute.xlu1 %1406 }
 0x5ad   :  { %1705 = vmatmul.mubr.msk.f32.vlgmr.msra.gmra.mrb[10].mxu0 %vm206_vm4, %v726_v10 }
 0x5ae   :  { %v1831_v11 = vpop.eup %1830  ;;  %1713 = vmatpush3.msra.mxu0 %v1949_v23  ;;  %1714 = vmatprep.mubr.msk.f32.mxu0 %vm1863_vm1, %v1862_v8 }
 0x5af   :  { %v898_v12 = vmul.f32 %v1831_v11, %v1817_v48  ;;  %v1403_v13 = vpop.xlane.xlu0 %1402  ;;  %1722 = vmatprep.subr.mxu0 %v1862_v8  ;;  %v1833_v14 = vpop.eup %1832 }
 0x5b0   :  { %1836 = vrcp.f32 %v1403_v13  ;;  %v1062_v15 = vmul.f32 %v1833_v14, %v1819_v50 }
 0x5b1   :  { %1715 = vmatmul.mubr.msk.f32.vlgmr.msra.gmra.mrb[12].mxu0 %vm206_vm4, %v898_v12 }
 0x5b2   :  { %1723 = vmatpush3.msra.mxu0 %v1065_v3  ;;  %1724 = vmatprep.mubr.msk.f32.mxu0 %vm1863_vm1, %v1862_v8  ;;  %v1835_v23 = vpop.eup %1834 }
 0x5b3   :  { %v1236_v16 = vpop.permute.xlu0 %1235  ;;  %1732 = vmatprep.subr.mxu0 %v1862_v8  ;;  %v1234_v17 = vmul.f32 %v1835_v23, %v1821_v55 }
 0x5b5   :  { %1725 = vmatmul.mubr.msk.f32.vlgmr.msra.gmra.mrb[14].mxu0 %vm206_vm4, %v1062_v15 }
 0x5b6   :  { %1733 = vmatpush3.msra.mxu0 %v1236_v16  ;;  %1734 = vmatprep.mubr.msk.f32.mxu0 %vm1863_vm1, %v1862_v8 }
 0x5b7   :  { %1742 = vmatprep.subr.mxu0 %v1862_v8 }
 0x5b9   :  { %1735 = vmatmul.mubr.msk.f32.vlgmr.msra.gmra.mrb[16].mxu0 %vm206_vm4, %v1234_v17 }
 0x5ba   :  { %v1837_v19 = vpop.eup %1836  ;;  %1743 = vmatpush3.msra.mxu0 %v1407_v18  ;;  %1744 = vmatprep.mubr.msk.f32.mxu0 %vm1863_vm1, %v1862_v8  ;;  %v1774_v8 = vpack.c.bf16 %v1490_v28, %v1489_v27 }
 0x5bb   :  { %v1405_v21 = vmul.f32 %v1837_v19, %v1823_v57 }
 0x5bc   :  { %1775 = vmatprep.subr.bf16.mxu1 %v1774_v8 }
 0x5bd   :  { %1745 = vmatmul.mubr.msk.f32.vlgmr.msra.gmra.mrb[18].mxu0 %vm206_vm4, %v1405_v21  ;;  %1777 = vmatpush3.bf16.msra.mxu1 %v1774_v8 }
 0x5be   :  { %1779 = vmatprep.subr.bf16.mxu1 %v1778_v32 }
 0x5c1   :  { %1781 = vmatpush3.bf16.msra.mxu1 %v1778_v32 }
 0x5c2   :  { %1783 = vmatprep.subr.bf16.mxu1 %v1782_v36 }
 0x5c5   :  { %1785 = vmatpush3.bf16.msra.mxu1 %v1782_v36 }
 0x5c6   :  { %1787 = vmatprep.subr.bf16.mxu1 %v1786_v41 }
 0x5c9   :  { %1789 = vmatpush3.bf16.msra.mxu1 %v1786_v41 }
 0x64b   :  { %v455_v22 = vpop.f32.mrb[6].mxu0 }
 0x64c   :  { %460 = vrot.lane.b32.xlu0 %v455_v22, %s1869_s14  ;;  %v1686_v24 = vpop.f32.mrb[7].mxu0 }
 0x64f   :  { %v627_v25 = vpop.f32.mrb[8].mxu0 }
 0x650   :  { %632 = vrot.lane.b32.xlu1 %v627_v25, %s1867_s12  ;;  %v1696_v26 = vpop.f32.mrb[9].mxu0 }
 0x680   :  { %v799_v33 = vpop.f32.mrb[10].mxu0 }
 0x681   :  { %804 = vrot.lane.b32.xlu1 %v799_v33, %s1864_s10  ;;  %v1706_v29 = vpop.f32.mrb[11].mxu0 }
 0x684   :  { %v968_v37 = vpop.f32.mrb[12].mxu0 }
 0x685   :  { %972 = vst.msk [vmem:[#allocation2 + $0x8] sm:$0xff] %vm129_vm2, %v968_v37  ;;  %v1716_v40 = vpop.f32.mrb[13].mxu0 }
 0x688   :  { %v1136_v42 = vpop.f32.mrb[14].mxu0 }
 0x689   :  { %1141 = vrot.lane.b32.xlu0 %v1136_v42, %s1869_s14  ;;  %v1726_v43 = vpop.f32.mrb[15].mxu0 }
 0x68c   :  { %v1307_v44 = vpop.f32.mrb[16].mxu0 }
 0x68d   :  { %1312 = vrot.lane.b32.xlu0 %v1307_v44, %s1867_s12  ;;  %v1736_v45 = vpop.f32.mrb[17].mxu0 }
 0x690   :  { %v1478_v46 = vpop.f32.mrb[18].mxu0 }
 0x691   :  { %1483 = vrot.lane.b32.xlu1 %v1478_v46, %s1864_s10  ;;  %v1746_v47 = vpop.f32.mrb[19].mxu0 }
 0x6be   :  { %v461_v48 = vpop.permute.xlu0 %460 }
 0x6bf   :  { %464 = vst.msk [vmem:[#allocation2] sm:$0xff] %vm463_vm5, %v461_v48 }
 0x6c2   :  { %v633_v49 = vpop.permute.xlu1 %632 }
 0x6c3   :  { %636 = vst.msk [vmem:[#allocation2] sm:$0xff] %vm635_vm6, %v633_v49 }
 0x6f3   :  { %v805_v20 = vpop.permute.xlu1 %804 }
 0x6f4   :  { %808 = vst.msk [vmem:[#allocation2] sm:$0xff] %vm807_vm7, %v805_v20 }
 0x6fb   :  { %v1142_v50 = vpop.permute.xlu0 %1141  ;;  %v1487_v51 = vld [vmem:[#allocation2] sm:$0xff] }
 0x6fc   :  { %1144 = vst.msk [vmem:[#allocation2 + $0x8] sm:$0xff] %vm463_vm5, %v1142_v50  ;;  %1763 = vmatprep.mubr.msk.f32.mxu1 %vm1497_vm8, %v1487_v51 }
 0x6ff   :  { %v1313_v52 = vpop.permute.xlu0 %1312 }
 0x700   :  { %1315 = vst.msk [vmem:[#allocation2 + $0x8] sm:$0xff] %vm635_vm6, %v1313_v52 }
 0x703   :  { %v1484_v53 = vpop.permute.xlu1 %1483 }
 0x704   :  { %1486 = vst.msk [vmem:[#allocation2 + $0x8] sm:$0xff] %vm807_vm7, %v1484_v53 }
 0x70b   :  { %v1488_v54 = vld [vmem:[#allocation2 + $0x8] sm:$0xff] }
 0x70c   :  { %1764 = vmatmul.mubr.msk.f32.vlgmr.msra.gmra.mrb[16].mxu1 %vm1497_vm8, %v1488_v54 }
 0x7df   :  { %v1765_v55 = vpop.f32.mrb[16].mxu1 }
 0x7e0   :  { %1580 = vst.msk [vmem:[#allocation4 + $0x8] sm:$0xff] %vm29_vm0, %v1765_v55  ;;  %v1570_v56 = vpop.f32.mrb[17].mxu1 }
 0x7e1   :  { %1579 = vst.msk [vmem:[#allocation4] sm:$0xff] %vm29_vm0, %v1570_v56 }
 0x7e2   :  { %1849 = shalt.err (!%p1846_p4)
}
 0x7e3   :  { %s1850_s1 = scalar_lea.hbm %s2132_s4, 256 }
 0x7e4   :  { %p1851_p5 = scmp.ne.s32.totalorder %s2132_s4, %s1850_s1  ;;  %p1854_p6 = scmp.lt.u32.totalorder %s1850_s1, %s2132_s4 }
 0x7e6   :  { %p1856_p7 = pnand %p1854_p6, %p1851_p5 }
 0x7e8   :  { %1859 = shalt.err (!%p1856_p7)
}
 0x7e9   :  { %s1872_s12 = smov 128   ;;  %s1873_s13 = smov 8  }
 0x7ea   :  { %1592 = dma.vmem_to_hbm [thread:$0]  %s1587_s5, 256, %s2132_s4, [#allocation5], %s1872_s12, %s1872_s12, %s1873_s13  }
 0x7eb   :  { %1860 = dma.done.wait [#allocation5], 256  }
 0x7ec   :  { %1861 = vsyncadd [#allocation5], 4294967040 }
 0x7ed   :  { %1596 = vsyncpa [#allocation5], 1 }

</bundles_post_ra>
